<compile_context>
chip_gen: v5e
topology: v5e:2x2
jax: 0.10.0
libtpu: 0.0.40
codegen_flags: <defaults>
</compile_context>

<pallas_src>
import jax
import jax.numpy as jnp
from jax.experimental import pallas as pl
from jax.experimental.pallas import tpu as pltpu


def _round_up(x, m):
    return ((x + m - 1) // m) * m


def gaussian_smearing_kernel(coeff_ref, dist_ref, offset_ref, out_ref):
    # coeff_ref:  (1, 1)          f32 scalar in SMEM
    # dist_ref:   (1, TILE_N)     distances, lane-contiguous
    # offset_ref: (R_PAD, 1)      RBF centers on the sublane axis (padded to 128-mult)
    # out_ref:    (TILE_N, num_rbf)  output tile, written once in its final layout
    coeff = coeff_ref[0, 0]
    d = dist_ref[...]                        # (1, T)
    off = offset_ref[...]                    # (R_PAD, 1)
    diff = d - off                           # (R_PAD, T)  lane-dense vregs
    vals = jnp.exp(coeff * (diff * diff))    # EUP exp, lane-dense
    # Transpose on the (otherwise idle) XLU so HBM is written once, directly in
    # the (N, num_rbf) convention.  Both dims are (8,128)-aligned by construction.
    vals_t = jnp.transpose(vals)             # (T, R_PAD)
    out_ref[...] = vals_t[:, : out_ref.shape[1]]   # drop padded RBF rows at the store


def gaussian_smearing(dist, offset, coeff, *, tile_n=8192):
    """dist: any shape, f32; offset: (num_rbf,) f32; coeff: () f32.

    Returns dist.shape + (num_rbf,) f32, matching the PyTorch forward:
        exp(coeff * (dist[..., None] - offset)**2)
    """
    orig_shape = dist.shape
    num_rbf = offset.shape[0]
    dist_flat = jnp.ravel(dist).astype(jnp.float32)
    n = dist_flat.shape[0]
    if n == 0:
        return jnp.zeros(orig_shape + (num_rbf,), jnp.float32)

    # Lane tile: multiple of 128; capped at half the 128-rounded problem so the
    # grid has >= 2 steps (both v7x TensorCores share the writeback) and tiny
    # inputs don't over-pad.
    n_pad128 = _round_up(n, 128)
    half = _round_up(pl.cdiv(n_pad128, 2), 128)
    tile = max(128, min(_round_up(tile_n, 128), half))
    grid_n = pl.cdiv(n, tile)

    # Pad only the (tiny) input up to a whole number of tiles; the output keeps
    # its exact row count and Pallas masks the ragged final block's writes.
    n_in = grid_n * tile
    dist2d = jnp.pad(dist_flat, (0, n_in - n)).reshape(1, n_in)

    # Pad RBF rows to a multiple of 128 so the in-kernel transpose is fully
    # (8,128)-aligned; padded rows are sliced off inside the kernel.
    r_pad = _round_up(num_rbf, 128)
    offset2d = jnp.pad(offset.astype(jnp.float32),
                       (0, r_pad - num_rbf)).reshape(r_pad, 1)
    coeff2d = jnp.asarray(coeff, jnp.float32).reshape(1, 1)

    # Only when n < 128 is the (single) block taller than the array; pad rows
    # there and slice after (negligible at that size).  For n >= 128 no slice.
    out_rows = max(n, tile)

    out = pl.pallas_call(
        gaussian_smearing_kernel,
        out_shape=jax.ShapeDtypeStruct((out_rows, num_rbf), jnp.float32),
        grid=(grid_n,),
        in_specs=[
            pl.BlockSpec(memory_space=pltpu.MemorySpace.SMEM),   # coeff scalar
            pl.BlockSpec((1, tile), lambda i: (0, i)),           # dist lane tile
            pl.BlockSpec((r_pad, 1), lambda i: (0, 0)),          # all RBF centers
        ],
        out_specs=pl.BlockSpec((tile, num_rbf), lambda i: (i, 0)),
        compiler_params=pltpu.CompilerParams(
            dimension_semantics=("parallel",),
            vmem_limit_bytes=32 * 1024 * 1024,
        ),
    )(coeff2d, dist2d, offset2d)

    if out_rows != n:
        out = out[:n]
    return out.reshape(orig_shape + (num_rbf,))


def init_gaussian_smearing_params(cutoff_lower=0.0, cutoff_upper=5.0, num_rbf=50):
    # Deterministic init, identical to the PyTorch module's _initial_params.
    offset = jnp.linspace(cutoff_lower, cutoff_upper, num_rbf, dtype=jnp.float32)
    coeff = -0.5 / (offset[1] - offset[0]) ** 2
    return offset, coeff


def reference(dist, offset, coeff):
    d = dist[..., None] - offset
    return jnp.exp(coeff * (d * d))


if __name__ == "__main__":
    cutoff_lower, cutoff_upper, num_rbf = 0.0, 5.0, 50
    offset, coeff = init_gaussian_smearing_params(cutoff_lower, cutoff_upper, num_rbf)

    key = jax.random.PRNGKey(0)

    # Case 1: 1-D distances, N not a multiple of 128 -> exercises the ragged
    # final output block and a 2-step grid.
    n = 300
    dist = jax.random.uniform(key, (n,), jnp.float32, cutoff_lower, cutoff_upper)
    out = jax.block_until_ready(gaussian_smearing(dist, offset, coeff))
    ref = reference(dist, offset, coeff)
    assert out.shape == (n, num_rbf)
    assert jnp.allclose(out, ref, atol=1e-5, rtol=1e-5)

    # Case 2: batched distances (PyTorch forward accepts any shape).
    dist2 = jax.random.uniform(jax.random.PRNGKey(0), (2, 64), jnp.float32,
                               cutoff_lower, cutoff_upper)
    out2 = jax.block_until_ready(gaussian_smearing(dist2, offset, coeff))
    assert out2.shape == (2, 64, num_rbf)
    assert jnp.allclose(out2, reference(dist2, offset, coeff), atol=1e-5, rtol=1e-5)

    print("KERNEL_OK")
</pallas_src>

<mosaic_0001>
module attributes {stable_mosaic.version = 11 : i64} {
  func.func @gaussian_smearing_kernel(%arg0: i32, %arg1: memref<1x1xf32, #tpu.memory_space<smem>>, %arg2: memref<1x256xf32, #tpu.memory_space<vmem>>, %arg3: memref<128x1xf32, #tpu.memory_space<vmem>>, %arg4: memref<256x50xf32, #tpu.memory_space<vmem>>) attributes {dimension_semantics = [#tpu.dimension_semantics<parallel>], iteration_bounds = array<i64: 2>, scalar_prefetch = 0 : i64, scratch_operands = 0 : i64, tpu.core_type = #tpu.core_type<tc>, window_params = [{transform_indices = @transform_0, window_bounds = array<i64: 1, 1>}, {transform_indices = @transform_1, window_bounds = array<i64: 1, 256>}, {pipeline_mode = #tpu.pipeline_mode<synchronous>, transform_indices = @transform_2, window_bounds = array<i64: 128, 1>}, {transform_indices = @transform_3, window_bounds = array<i64: 256, 50>}]} {
    %c0 = arith.constant 0 : index
    %c0_0 = arith.constant 0 : index
    %0 = memref.load %arg1[%c0, %c0_0] : memref<1x1xf32, #tpu.memory_space<smem>>
    %c0_1 = arith.constant 0 : index
    %c0_2 = arith.constant 0 : index
    %1 = vector.load %arg2[%c0_1, %c0_2] : memref<1x256xf32, #tpu.memory_space<vmem>>, vector<1x256xf32>
    %c0_3 = arith.constant 0 : index
    %c0_4 = arith.constant 0 : index
    %2 = vector.load %arg3[%c0_3, %c0_4] : memref<128x1xf32, #tpu.memory_space<vmem>>, vector<128x1xf32>
    %3 = vector.broadcast %1 : vector<1x256xf32> to vector<128x256xf32>
    %4 = vector.broadcast %2 : vector<128x1xf32> to vector<128x256xf32>
    %5 = arith.subf %3, %4 : vector<128x256xf32>
    %6 = arith.mulf %5, %5 : vector<128x256xf32>
    %7 = vector.broadcast %0 : f32 to vector<128x256xf32>
    %8 = arith.mulf %7, %6 : vector<128x256xf32>
    %9 = math.exp %8 : vector<128x256xf32>
    %10 = tpu.transpose %9, [1, 0] : vector<128x256xf32> -> vector<256x128xf32>
    %11 = vector.extract_strided_slice %10 {offsets = [0, 0], sizes = [256, 50], strides = [1, 1]} : vector<256x128xf32> to vector<256x50xf32>
    %c0_5 = arith.constant 0 : index
    %c0_6 = arith.constant 0 : index
    %12 = vector.load %arg4[%c0_5, %c0_6] : memref<256x50xf32, #tpu.memory_space<vmem>>, vector<256x50xf32>
    tpu.vector_store %arg4[%c0_5, %c0_6], %11 {strides = array<i32>} : memref<256x50xf32, #tpu.memory_space<vmem>>, vector<256x50xf32>,
    return
  }
  func.func @transform_0(%arg0: i32) -> (i32, i32) {
    %c0_i32 = arith.constant 0 : i32
    %c0_i32_0 = arith.constant 0 : i32
    %c0_i32_1 = arith.constant 0 : i32
    return %c0_i32, %c0_i32_0 : i32, i32
  }
  func.func @transform_1(%arg0: i32) -> (i32, i32) {
    %c0_i32 = arith.constant 0 : i32
    %c0_i32_0 = arith.constant 0 : i32
    return %c0_i32, %arg0 : i32, i32
  }
  func.func @transform_2(%arg0: i32) -> (i32, i32) {
    %c0_i32 = arith.constant 0 : i32
    %c0_i32_0 = arith.constant 0 : i32
    %c0_i32_1 = arith.constant 0 : i32
    return %c0_i32, %c0_i32_0 : i32, i32
  }
  func.func @transform_3(%arg0: i32) -> (i32, i32) {
    %c0_i32 = arith.constant 0 : i32
    %c0_i32_0 = arith.constant 0 : i32
    return %arg0, %c0_i32 : i32, i32
  }
}

</mosaic_0001>

<bundles_post_ra>
// kernel: tpu_custom_call.1
= control target key start
LH: loop header
LB: loop body
LE: loop exit
PB: predicated region body
PF: predicated region fallthrough
CT: control target
= control target key end

     0   :  { %s1586_s0 = inlined_call_operand.<no memory space> [shape: f32[1,1], index: 0, kind: input, shape index: {}]   ;;  %s1587_s1 = inlined_call_operand.vmem [shape: f32[1,512], index: 1, kind: input, shape index: {}]   ;;  %s1588_s2 = inlined_call_operand.vmem [shape: f32[128,1], index: 2, kind: input, shape index: {}]   ;;  %s1589_s3 = inlined_call_operand.vmem [shape: f32[300,50], index: 3, kind: output, shape index: {}]  }
   0x1   :  { %8 = sst [smem:[#allocation2]] %s1586_s0 }
   0x2   :  { %s1162_s14 = smov 0   ;;  %s1164_s15 = smov 0  }
   0x3   :  { %s1166_s16 = smov 0  }
   0x4 LB: > { %s1175_s0 = sadd.s32 4294967295, %s1104_s16   ;;  %s1177_s17 = sadd.s32 1, %s1104_s16   ;;  %s1104_s16 = sphi %s1166_s16, %s1598_s16   ;;  %s1100_s15 = sphi %s1164_s15, %s1597_s15   ;;  %s1096_s14 = sphi %s1162_s14, %s1596_s14  }
   0x5   : > { %s86_s18 = ssub.s32 %s1104_s16, %s1177_s17  ;;  %s89_s19 = sadd.s32 1, %s1100_s15 }
   0x6   : > { %p87_p0 = scmp.eq.s32.totalorder %s86_s18, 0  ;;  %p99_p1 = scmp.ne.s32.totalorder %s1100_s15, %s1096_s14 }
   0x7   : > { %p100_p2 = scmp.eq.s32.totalorder %s1175_s0, 1  ;;  %p871_p3 = scmp.ge.s32.totalorder %s1104_s16, 1 }
   0x8   : > { %s1185_s20 = scalar_select %p87_p0, %s1100_s15, %s89_s19  }
   0x9   : > { %p1187_p4 = por %p100_p2, %p99_p1  ;;  %p138_p5 = scmp.lt.s32.totalorder %s1104_s16, 3 }
   0xb   : > { %p139_p6 = pnand %p871_p3, %p138_p5 }
   0xc   : > { %s873_s5 = sshll.u32 (!%p139_p6), %s1175_s0, 1  ;;  %s170_s9 = sld [smem:[#allocation2]] (!%p139_p6) }
   0xd   : > { %142 = sbr.rel (%p139_p6) target bundleno = 500 (0x1f4), region = 32  ;;  %p161_p7 = scmp.lt.s32.totalorder (!%p139_p6), %s873_s5, 3 }
   0xe   : > { %s157_s10 = sand.u32 (!%p139_p6), 1, %s1096_s14  }
   0xf   : > { %s872_s11 = sshll.u32 (!%p139_p6), %s157_s10, 8 }
  0x10   : > { %s1378_s12 = scalar_lea.vmem (!%p139_p6), [#allocation3], %s872_s11  }
  0x12   : > { %v174_v0 = vld [vmem:[%s1588_s2 + $0x10] sm:$0xff]  ;;  %v172_v1 = vld [vmem:[%s1588_s2] sm:$0xff]  ;;  %v1138_v2 = vmov 0   ;;  %v175_v4 = vld [vmem:[%s1588_s2 + $0x18] sm:$0xff]  ;;  %s1600_s5 = smov (!%p161_p7, %s873_s5), 3  ;;  %v1253_v27 = vstv %s170_s9  ;;  %vm498_vm0 = vcmask 408576  }
  0x13   : > { %984 = vset.pattern.permute.xlu1 %v1138_v2  ;;  %983 = vset.pattern.permute.xlu0 %v1138_v2  ;;  %v176_v3 = vld [vmem:[%s1588_s2 + $0x20] sm:$0xff]  ;;  %v173_v5 = vld [vmem:[%s1588_s2 + $0x8] sm:$0xff]  ;;  %v179_v7 = vld [vmem:[%s1588_s2 + $0x38] sm:$0xff]  ;;  %s163_s8 = scalar_lea.vmem %s1587_s1, %s1600_s5  ;;  %s875_s14 = sshll.u32 (%p1187_p4), %s1175_s0, 5 }
  0x14   : > { %205 = vperm.xlu1 %984, %v174_v0   ;;  %195 = vperm.xlu0 %983, %v172_v1   ;;  %v177_v6 = vld [vmem:[%s1588_s2 + $0x28] sm:$0xff]  ;;  %v178_v8 = vld [vmem:[%s1588_s2 + $0x30] sm:$0xff]  ;;  %v180_v9 = vld [vmem:[%s1588_s2 + $0x40] sm:$0xff]  ;;  %s891_s13 = sshll.u32 (%p1187_p4), %s1175_s0, 8  ;;  %s539_s16 = ssub.s32 (%p1187_p4), 38, %s875_s14 }
  0x15   : > { %985 = vset.pattern.permute.xlu2 %v1138_v2  ;;  %v182_v10 = vld [vmem:[%s1588_s2 + $0x50] sm:$0xff]  ;;  %v181_v11 = vld [vmem:[%s1588_s2 + $0x48] sm:$0xff]  ;;  %v183_v12 = vld [vmem:[%s1588_s2 + $0x58] sm:$0xff]  ;;  %s1451_s22 = scalar_lea.vmem (%p1187_p4), %s1589_s3, %s891_s13   ;;  %p540_p8 = scmp.lt.s32.totalorder (%p1187_p4), %s539_s16, 32 }
  0x16   : > { %215 = vperm.xlu2 %985, %v176_v3   ;;  %v185_v13 = vld [vmem:[%s1588_s2 + $0x68] sm:$0xff]  ;;  %v184_v14 = vld [vmem:[%s1588_s2 + $0x60] sm:$0xff]  ;;  %v186_v15 = vld [vmem:[%s1588_s2 + $0x70] sm:$0xff] }
  0x17   : > { %v187_v16 = vld [vmem:[%s1588_s2 + $0x78] sm:$0xff]  ;;  %v171_v19 = vld [vmem:[%s163_s8] sm:$0x3] }
  0x18   : > { %v1247_v20 = vperm.slane %v171_v19, 0  ;;  %v1249_v21 = vperm.slane %v171_v19, 1 }
  0x1c   : > { %210 = vperm.xlu1 %984, %v175_v4   ;;  %200 = vperm.xlu0 %983, %v173_v5  }
  0x1e   : > { %220 = vperm.xlu2 %985, %v177_v6  }
  0x24   : > { %230 = vperm.xlu1 %984, %v179_v7   ;;  %225 = vperm.xlu0 %983, %v178_v8  }
  0x26   : > { %235 = vperm.xlu2 %985, %v180_v9  }
  0x2c   : > { %245 = vperm.xlu1 %984, %v182_v10   ;;  %240 = vperm.xlu0 %983, %v181_v11  }
  0x2e   : > { %250 = vperm.xlu2 %985, %v183_v12  }
  0x34   : > { %260 = vperm.xlu1 %984, %v185_v13   ;;  %255 = vperm.xlu0 %983, %v184_v14  }
  0x36   : > { %265 = vperm.xlu2 %985, %v186_v15  }
  0x3c   : > { %270 = vperm.xlu0 %983, %v187_v16  }
  0x70   : > { %v1240_v17 = vpop.permute.xlu2 %215 }
  0x71   : > { %v281_v15 = vsub.f32 %v1247_v20, %v1240_v17 }
  0x78   : > { %v1242_v18 = vpop.permute.xlu2 %220 }
  0x80   : > { %v236_v22 = vpop.permute.xlu2 %235 }
  0x81   : > { %v289_v23 = vsub.f32 %v1247_v20, %v236_v22  ;;  %v290_v24 = vsub.f32 %v1249_v21, %v236_v22 }
  0x83   : > { %v321_v25 = vmul.f32 %v289_v23, %v289_v23  ;;  %v322_v26 = vmul.f32 %v290_v24, %v290_v24 }
  0x85   : > { %v1256_v28 = vmul.f32 %v1253_v27, %v321_v25  ;;  %v1259_v29 = vmul.f32 %v1253_v27, %v322_v26 }
  0x86   : > { %v206_v30 = vpop.permute.xlu1 %205  ;;  %v196_v31 = vpop.permute.xlu0 %195 }
  0x87   : > { %v273_v32 = vsub.f32 %v1247_v20, %v196_v31  ;;  %v274_v33 = vsub.f32 %v1249_v21, %v196_v31  ;;  %v277_v49 = vsub.f32 %v1247_v20, %v206_v30  ;;  %v278_v51 = vsub.f32 %v1249_v21, %v206_v30 }
  0x88   : > { %v251_v34 = vpop.permute.xlu2 %250  ;;  %v282_v31 = vsub.f32 %v1249_v21, %v1240_v17 }
  0x89   : > { %v305_v35 = vmul.f32 %v273_v32, %v273_v32  ;;  %v306_v36 = vmul.f32 %v274_v33, %v274_v33  ;;  %v295_v37 = vsub.f32 %v1247_v20, %v251_v34  ;;  %v296_v38 = vsub.f32 %v1249_v21, %v251_v34 }
  0x8a   : > { %v309_v58 = vmul.f32 %v277_v49, %v277_v49  ;;  %v310_v60 = vmul.f32 %v278_v51, %v278_v51 }
  0x8b   : > { %v338_v39 = vmul.f32 %v1253_v27, %v305_v35  ;;  %v339_v40 = vmul.f32 %v1253_v27, %v306_v36  ;;  %v327_v41 = vmul.f32 %v295_v37, %v295_v37  ;;  %v328_v42 = vmul.f32 %v296_v38, %v296_v38 }
  0x8c   : > { %v342_v7 = vmul.f32 %v1253_v27, %v309_v58  ;;  %v343_v9 = vmul.f32 %v1253_v27, %v310_v60 }
  0x8d   : > { %v370_v43 = vmul.f32 1.442695, %v338_v39  ;;  %v372_v44 = vmul.f32 1.442695, %v339_v40  ;;  %v1268_v47 = vmul.f32 %v1253_v27, %v327_v41  ;;  %v1271_v48 = vmul.f32 %v1253_v27, %v328_v42 }
  0x8e   : > { %v211_v45 = vpop.permute.xlu1 %210  ;;  %v201_v46 = vpop.permute.xlu0 %200  ;;  %v378_v12 = vmul.f32 1.442695, %v342_v7  ;;  %v380_v13 = vmul.f32 1.442695, %v343_v9  ;;  %v313_v39 = vmul.f32 %v281_v15, %v281_v15  ;;  %v314_v42 = vmul.f32 %v282_v31, %v282_v31 }
  0x8f   : > { %v275_v50 = vsub.f32 %v1247_v20, %v201_v46  ;;  %v276_v52 = vsub.f32 %v1249_v21, %v201_v46  ;;  %986 = vpow2.f32 %v370_v43  ;;  %v279_v10 = vsub.f32 %v1247_v20, %v211_v45 }
  0x90   : > { %v266_v53 = vpop.permute.xlu2 %265  ;;  %988 = vpow2.f32 %v372_v44  ;;  %v280_v11 = vsub.f32 %v1249_v21, %v211_v45 }
  0x91   : > { %v307_v54 = vmul.f32 %v275_v50, %v275_v50  ;;  %v308_v55 = vmul.f32 %v276_v52, %v276_v52  ;;  %v301_v56 = vsub.f32 %v1247_v20, %v266_v53  ;;  %v302_v57 = vsub.f32 %v1249_v21, %v266_v53 }
  0x92   : > { %v311_v14 = vmul.f32 %v279_v10, %v279_v10  ;;  %v312_v16 = vmul.f32 %v280_v11, %v280_v11  ;;  %v346_v52 = vmul.f32 %v1253_v27, %v313_v39 }
  0x93   : > { %v340_v59 = vmul.f32 %v1253_v27, %v307_v54  ;;  %v341_v61 = vmul.f32 %v1253_v27, %v308_v55  ;;  %v333_v62 = vmul.f32 %v301_v56, %v301_v56  ;;  %v334_v63 = vmul.f32 %v302_v57, %v302_v57 }
  0x94   : > { %v344_v33 = vmul.f32 %v1253_v27, %v311_v14  ;;  %v345_v37 = vmul.f32 %v1253_v27, %v312_v16  ;;  %v347_v56 = vmul.f32 %v1253_v27, %v314_v42  ;;  %v283_v57 = vsub.f32 %v1247_v20, %v1242_v18 }
  0x95   : > { %v374_v0 = vmul.f32 1.442695, %v340_v59  ;;  %v376_v1 = vmul.f32 1.442695, %v341_v61  ;;  %v1286_v4 = vmul.f32 %v1253_v27, %v333_v62  ;;  %v1289_v5 = vmul.f32 %v1253_v27, %v334_v63  ;;  %v987_v6 = vpop.eup %986 }
  0x96   : > { %v1281_v2 = vpop.permute.xlu1 %230  ;;  %v1283_v3 = vpop.permute.xlu0 %225  ;;  %434 = vxpose.xlu1.b32.start [1/16] %v987_v6, 128  ;;  %v382_v45 = vmul.f32 1.442695, %v344_v33  ;;  %v384_v49 = vmul.f32 1.442695, %v345_v37  ;;  %v284_v62 = vsub.f32 %v1249_v21, %v1242_v18  ;;  %v315_v10 = vmul.f32 %v283_v57, %v283_v57 }
  0x97   : > { %v989_v8 = vpop.eup %988  ;;  %990 = vpow2.f32 %v374_v0  ;;  %v386_v0 = vmul.f32 1.442695, %v346_v52  ;;  %v287_v37 = vsub.f32 %v1247_v20, %v1281_v2 }
  0x98   : > { %466 = vxpose.xlu2.b32.start [1/16] %v989_v8, 128  ;;  %992 = vpow2.f32 %v376_v1  ;;  %v388_v8 = vmul.f32 1.442695, %v347_v56  ;;  %v316_v11 = vmul.f32 %v284_v62, %v284_v62  ;;  %v348_v16 = vmul.f32 %v1253_v27, %v315_v10 }
  0x99   : > { %994 = vpow2.f32 %v378_v12  ;;  %v319_v42 = vmul.f32 %v287_v37, %v287_v37 }
  0x9a   : > { %996 = vpow2.f32 %v380_v13 }
  0x9b   : > { %998 = vpow2.f32 %v382_v45 }
  0x9c   : > { %1000 = vpow2.f32 %v384_v49 }
  0x9d   : > { %v991_v23 = vpop.eup %990  ;;  %1002 = vpow2.f32 %v386_v0 }
  0x9e   : > { %v246_v19 = vpop.permute.xlu1 %245  ;;  %v241_v22 = vpop.permute.xlu0 %240  ;;  %435 = vxpose.xlu1.b32.cont [2/16] %v991_v23, 128  ;;  %1004 = vpow2.f32 %v388_v8 }
  0x9f   : > { %v293_v24 = vsub.f32 %v1247_v20, %v246_v19  ;;  %v294_v25 = vsub.f32 %v1249_v21, %v246_v19  ;;  %v291_v26 = vsub.f32 %v1247_v20, %v241_v22  ;;  %v993_v30 = vpop.eup %992  ;;  %v292_v32 = vsub.f32 %v1249_v21, %v241_v22 }
  0xa0   : > { %467 = vxpose.xlu2.b32.cont [2/16] %v993_v30, 128  ;;  %v995_v44 = vpop.eup %994  ;;  %v285_v19 = vsub.f32 %v1247_v20, %v1283_v3 }
  0xa1   : > { %v325_v34 = vmul.f32 %v293_v24, %v293_v24  ;;  %v326_v35 = vmul.f32 %v294_v25, %v294_v25  ;;  %v323_v36 = vmul.f32 %v291_v26, %v291_v26  ;;  %v324_v38 = vmul.f32 %v292_v32, %v292_v32  ;;  %v997_v46 = vpop.eup %996 }
  0xa2   : > { %v999_v18 = vpop.eup %998  ;;  %v349_v24 = vmul.f32 %v1253_v27, %v316_v11  ;;  %v286_v25 = vsub.f32 %v1249_v21, %v1283_v3  ;;  %v390_v32 = vmul.f32 1.442695, %v348_v16  ;;  %v317_v33 = vmul.f32 %v285_v19, %v285_v19 }
  0xa3   : > { %v1306_v40 = vmul.f32 %v1253_v27, %v325_v34  ;;  %v1309_v41 = vmul.f32 %v1253_v27, %v326_v35  ;;  %v1312_v17 = vmul.f32 %v1253_v27, %v323_v36  ;;  %v1315_v43 = vmul.f32 %v1253_v27, %v324_v38  ;;  %v1001_v15 = vpop.eup %1000 }
  0xa4   : > { %v1003_v31 = vpop.eup %1002  ;;  %v392_v35 = vmul.f32 1.442695, %v349_v24  ;;  %v318_v36 = vmul.f32 %v286_v25, %v286_v25  ;;  %1006 = vpow2.f32 %v390_v32  ;;  %v350_v38 = vmul.f32 %v1253_v27, %v317_v33 }
  0xa5   : > { %v1005_v34 = vpop.eup %1004  ;;  %v288_v3 = vsub.f32 %v1249_v21, %v1281_v2  ;;  %v402_v2 = vmul.f32 1.442695, %v1256_v28  ;;  %v410_v28 = vmul.f32 1.442695, %v1306_v40 }
  0xa6   : > { %v261_v50 = vpop.permute.xlu1 %260  ;;  %v256_v51 = vpop.permute.xlu0 %255  ;;  %436 = vxpose.xlu1.b32.cont [3/16] %v995_v44, 128  ;;  %1008 = vpow2.f32 %v392_v35  ;;  %v351_v39 = vmul.f32 %v1253_v27, %v318_v36  ;;  %v394_v44 = vmul.f32 1.442695, %v350_v38 }
  0xa7   : > { %v299_v53 = vsub.f32 %v1247_v20, %v261_v50  ;;  %v300_v54 = vsub.f32 %v1249_v21, %v261_v50  ;;  %v297_v55 = vsub.f32 %v1247_v20, %v256_v51  ;;  %v298_v58 = vsub.f32 %v1249_v21, %v256_v51 }
  0xa8   : > { %468 = vxpose.xlu2.b32.cont [3/16] %v997_v46, 128  ;;  %v320_v45 = vmul.f32 %v288_v3, %v288_v3  ;;  %v396_v46 = vmul.f32 1.442695, %v351_v39  ;;  %v352_v51 = vmul.f32 %v1253_v27, %v319_v42  ;;  %1010 = vpow2.f32 %v394_v44 }
  0xa9   : > { %v331_v59 = vmul.f32 %v299_v53, %v299_v53  ;;  %v332_v60 = vmul.f32 %v300_v54, %v300_v54  ;;  %v329_v61 = vmul.f32 %v297_v55, %v297_v55  ;;  %v330_v63 = vmul.f32 %v298_v58, %v298_v58 }
  0xaa   : > { %v1007_v49 = vpop.eup %1006  ;;  %1012 = vpow2.f32 %v396_v46  ;;  %v398_v52 = vmul.f32 1.442695, %v352_v51  ;;  %v404_v55 = vmul.f32 1.442695, %v1259_v29  ;;  %v408_v58 = vmul.f32 1.442695, %v1315_v43 }
  0xab   : > { %v1328_v1 = vmul.f32 %v1253_v27, %v331_v59  ;;  %v1331_v6 = vmul.f32 %v1253_v27, %v332_v60  ;;  %v1334_v7 = vmul.f32 %v1253_v27, %v329_v61  ;;  %v1337_v9 = vmul.f32 %v1253_v27, %v330_v63 }
  0xac   : > { %v1009_v50 = vpop.eup %1008  ;;  %1014 = vpow2.f32 %v398_v52  ;;  %v412_v29 = vmul.f32 1.442695, %v1309_v41  ;;  %v416_v43 = vmul.f32 1.442695, %v1271_v48 }
  0xad   : > { %v418_v40 = vmul.f32 1.442695, %v1334_v7  ;;  %v420_v41 = vmul.f32 1.442695, %v1337_v9  ;;  %v424_v48 = vmul.f32 1.442695, %v1331_v6 }
  0xae   : > { %v271_v12 = vpop.permute.xlu0 %270  ;;  %437 = vxpose.xlu1.b32.cont [4/16] %v999_v18, 128  ;;  %v1011_v54 = vpop.eup %1010  ;;  %v426_v7 = vmul.f32 1.442695, %v1286_v4  ;;  %v428_v9 = vmul.f32 1.442695, %v1289_v5 }
  0xaf   : > { %v303_v13 = vsub.f32 %v1247_v20, %v271_v12  ;;  %v304_v14 = vsub.f32 %v1249_v21, %v271_v12  ;;  %v353_v20 = vmul.f32 %v1253_v27, %v320_v45 }
  0xb0   : > { %469 = vxpose.xlu2.b32.cont [4/16] %v1001_v15, 128  ;;  %v1013_v21 = vpop.eup %1012 }
  0xb1   : > { %v335_v22 = vmul.f32 %v303_v13, %v303_v13  ;;  %v336_v23 = vmul.f32 %v304_v14, %v304_v14  ;;  %v400_v53 = vmul.f32 1.442695, %v353_v20 }
  0xb2   : > { %v1015_v56 = vpop.eup %1014 }
  0xb3   : > { %v1348_v26 = vmul.f32 %v1253_v27, %v335_v22  ;;  %v1351_v30 = vmul.f32 %v1253_v27, %v336_v23  ;;  %1016 = vpow2.f32 %v400_v53  ;;  %v406_v27 = vmul.f32 1.442695, %v1312_v17 }
  0xb4   : > { %1018 = vpow2.f32 %v402_v2  ;;  %v414_v17 = vmul.f32 1.442695, %v1268_v47  ;;  %v422_v47 = vmul.f32 1.442695, %v1328_v1 }
  0xb5   : > { %1020 = vpow2.f32 %v404_v55  ;;  %v430_v1 = vmul.f32 1.442695, %v1348_v26  ;;  %v432_v6 = vmul.f32 1.442695, %v1351_v30 }
  0xb6   : > { %438 = vxpose.xlu1.b32.cont [5/16] %v1003_v31, 128  ;;  %1022 = vpow2.f32 %v406_v27 }
  0xb7   : > { %1024 = vpow2.f32 %v408_v58 }
  0xb8   : > { %470 = vxpose.xlu2.b32.cont [5/16] %v1005_v34, 128  ;;  %1026 = vpow2.f32 %v410_v28 }
  0xb9   : > { %v1017_v57 = vpop.eup %1016  ;;  %1028 = vpow2.f32 %v412_v29 }
  0xba   : > { %v1019_v59 = vpop.eup %1018  ;;  %1030 = vpow2.f32 %v414_v17 }
  0xbb   : > { %v1021_v60 = vpop.eup %1020  ;;  %1032 = vpow2.f32 %v416_v43 }
  0xbc   : > { %v1023_v61 = vpop.eup %1022  ;;  %1034 = vpow2.f32 %v418_v40 }
  0xbd   : > { %v1025_v62 = vpop.eup %1024  ;;  %1036 = vpow2.f32 %v420_v41 }
  0xbe   : > { %439 = vxpose.xlu1.b32.cont [6/16] %v1007_v49, 128  ;;  %v1027_v63 = vpop.eup %1026  ;;  %1038 = vpow2.f32 %v422_v47 }
  0xbf   : > { %v1029_v0 = vpop.eup %1028  ;;  %1040 = vpow2.f32 %v424_v48 }
  0xc0   : > { %471 = vxpose.xlu2.b32.cont [6/16] %v1009_v50, 128  ;;  %v1031_v8 = vpop.eup %1030  ;;  %1042 = vpow2.f32 %v426_v7 }
  0xc1   : > { %v1033_v10 = vpop.eup %1032  ;;  %1044 = vpow2.f32 %v428_v9 }
  0xc2   : > { %v1035_v11 = vpop.eup %1034  ;;  %1046 = vpow2.f32 %v430_v1 }
  0xc3   : > { %v1037_v12 = vpop.eup %1036  ;;  %1048 = vpow2.f32 %v432_v6 }
  0xc4   : > { %v1039_v18 = vpop.eup %1038 }
  0xc5   : > { %v1041_v13 = vpop.eup %1040 }
  0xc6   : > { %440 = vxpose.xlu1.b32.cont [7/16] %v1011_v54, 128  ;;  %v1043_v14 = vpop.eup %1042 }
  0xc7   : > { %v1045_v15 = vpop.eup %1044 }
  0xc8   : > { %472 = vxpose.xlu2.b32.cont [7/16] %v1013_v21, 128  ;;  %v1047_v4 = vpop.eup %1046 }
  0xc9   : > { %v1049_v16 = vpop.eup %1048 }
  0xce   : > { %441 = vxpose.xlu1.b32.cont [8/16] %v1015_v56, 128 }
  0xd0   : > { %473 = vxpose.xlu2.b32.cont [8/16] %v1017_v57, 128 }
  0xd6   : > { %442 = vxpose.xlu1.b32.cont [9/16] %v1019_v59, 128 }
  0xd8   : > { %474 = vxpose.xlu2.b32.cont [9/16] %v1021_v60, 128 }
  0xde   : > { %443 = vxpose.xlu1.b32.cont [10/16] %v1023_v61, 128 }
  0xe0   : > { %475 = vxpose.xlu2.b32.cont [10/16] %v1025_v62, 128 }
  0xe6   : > { %444 = vxpose.xlu1.b32.cont [11/16] %v1027_v63, 128 }
  0xe8   : > { %476 = vxpose.xlu2.b32.cont [11/16] %v1029_v0, 128 }
  0xee   : > { %445 = vxpose.xlu1.b32.cont [12/16] %v1031_v8, 128 }
  0xf0   : > { %477 = vxpose.xlu2.b32.cont [12/16] %v1033_v10, 128 }
  0xf6   : > { %446 = vxpose.xlu1.b32.cont [13/16] %v1035_v11, 128 }
  0xf8   : > { %478 = vxpose.xlu2.b32.cont [13/16] %v1037_v12, 128 }
  0xfe   : > { %447 = vxpose.xlu1.b32.cont [14/16] %v1039_v18, 128 }
 0x100   : > { %479 = vxpose.xlu2.b32.cont [14/16] %v1041_v13, 128 }
 0x106   : > { %448 = vxpose.xlu1.b32.cont [15/16] %v1043_v14, 128 }
 0x108   : > { %480 = vxpose.xlu2.b32.cont [15/16] %v1045_v15, 128 }
 0x10e   : > { %449 = vxpose.xlu1.b32.end [16/16] %v1047_v4, 128 }
 0x110   : > { %481 = vxpose.xlu2.b32.end [16/16] %v1049_v16, 128 }
 0x131   : > { %v482_v5 = vpop.trf.xlu2 }
 0x132   : > { %515 = vst.msk [vmem:[%s1378_s12 + $0x80] sm:$0xff] %vm498_vm0, %v482_v5 }
 0x139   : > { %v483_v19 = vpop.trf.xlu2 }
 0x13a   : > { %516 = vst.msk [vmem:[%s1378_s12 + $0x88] sm:$0xff] %vm498_vm0, %v483_v19  ;;  %v450_v22 = vpop.trf.xlu1 }
 0x13b   : > { %499 = vst.msk [vmem:[%s1378_s12] sm:$0xff] %vm498_vm0, %v450_v22 }
 0x141   : > { %v484_v23 = vpop.trf.xlu2 }
 0x142   : > { %517 = vst.msk [vmem:[%s1378_s12 + $0x90] sm:$0xff] %vm498_vm0, %v484_v23  ;;  %v451_v24 = vpop.trf.xlu1 }
 0x143   : > { %500 = vst.msk [vmem:[%s1378_s12 + $0x8] sm:$0xff] %vm498_vm0, %v451_v24 }
 0x149   : > { %v485_v25 = vpop.trf.xlu2 }
 0x14a   : > { %518 = vst.msk [vmem:[%s1378_s12 + $0x98] sm:$0xff] %vm498_vm0, %v485_v25  ;;  %v452_v26 = vpop.trf.xlu1 }
 0x14b   : > { %501 = vst.msk [vmem:[%s1378_s12 + $0x10] sm:$0xff] %vm498_vm0, %v452_v26 }
 0x151   : > { %v486_v30 = vpop.trf.xlu2 }
 0x152   : > { %519 = vst.msk [vmem:[%s1378_s12 + $0xa0] sm:$0xff] %vm498_vm0, %v486_v30  ;;  %v453_v31 = vpop.trf.xlu1 }
 0x153   : > { %502 = vst.msk [vmem:[%s1378_s12 + $0x18] sm:$0xff] %vm498_vm0, %v453_v31 }
 0x159   : > { %v487_v32 = vpop.trf.xlu2 }
 0x15a   : > { %520 = vst.msk [vmem:[%s1378_s12 + $0xa8] sm:$0xff] %vm498_vm0, %v487_v32  ;;  %v454_v33 = vpop.trf.xlu1 }
 0x15b   : > { %503 = vst.msk [vmem:[%s1378_s12 + $0x20] sm:$0xff] %vm498_vm0, %v454_v33 }
 0x161   : > { %v488_v34 = vpop.trf.xlu2 }
 0x162   : > { %521 = vst.msk [vmem:[%s1378_s12 + $0xb0] sm:$0xff] %vm498_vm0, %v488_v34  ;;  %v455_v35 = vpop.trf.xlu1 }
 0x163   : > { %504 = vst.msk [vmem:[%s1378_s12 + $0x28] sm:$0xff] %vm498_vm0, %v455_v35 }
 0x169   : > { %v489_v36 = vpop.trf.xlu2 }
 0x16a   : > { %522 = vst.msk [vmem:[%s1378_s12 + $0xb8] sm:$0xff] %vm498_vm0, %v489_v36  ;;  %v456_v37 = vpop.trf.xlu1 }
 0x16b   : > { %505 = vst.msk [vmem:[%s1378_s12 + $0x30] sm:$0xff] %vm498_vm0, %v456_v37 }
 0x171   : > { %v490_v38 = vpop.trf.xlu2 }
 0x172   : > { %523 = vst.msk [vmem:[%s1378_s12 + $0xc0] sm:$0xff] %vm498_vm0, %v490_v38  ;;  %v457_v3 = vpop.trf.xlu1 }
 0x173   : > { %506 = vst.msk [vmem:[%s1378_s12 + $0x38] sm:$0xff] %vm498_vm0, %v457_v3 }
 0x179   : > { %v491_v39 = vpop.trf.xlu2 }
 0x17a   : > { %524 = vst.msk [vmem:[%s1378_s12 + $0xc8] sm:$0xff] %vm498_vm0, %v491_v39  ;;  %v458_v42 = vpop.trf.xlu1 }
 0x17b   : > { %507 = vst.msk [vmem:[%s1378_s12 + $0x40] sm:$0xff] %vm498_vm0, %v458_v42 }
 0x181   : > { %v492_v44 = vpop.trf.xlu2 }
 0x182   : > { %525 = vst.msk [vmem:[%s1378_s12 + $0xd0] sm:$0xff] %vm498_vm0, %v492_v44  ;;  %v459_v45 = vpop.trf.xlu1 }
 0x183   : > { %508 = vst.msk [vmem:[%s1378_s12 + $0x48] sm:$0xff] %vm498_vm0, %v459_v45 }
 0x189   : > { %v493_v46 = vpop.trf.xlu2 }
 0x18a   : > { %526 = vst.msk [vmem:[%s1378_s12 + $0xd8] sm:$0xff] %vm498_vm0, %v493_v46  ;;  %v460_v49 = vpop.trf.xlu1 }
 0x18b   : > { %509 = vst.msk [vmem:[%s1378_s12 + $0x50] sm:$0xff] %vm498_vm0, %v460_v49 }
 0x191   : > { %v494_v50 = vpop.trf.xlu2 }
 0x192   : > { %527 = vst.msk [vmem:[%s1378_s12 + $0xe0] sm:$0xff] %vm498_vm0, %v494_v50  ;;  %v461_v51 = vpop.trf.xlu1 }
 0x193   : > { %510 = vst.msk [vmem:[%s1378_s12 + $0x58] sm:$0xff] %vm498_vm0, %v461_v51 }
 0x199   : > { %v495_v20 = vpop.trf.xlu2 }
 0x19a   : > { %528 = vst.msk [vmem:[%s1378_s12 + $0xe8] sm:$0xff] %vm498_vm0, %v495_v20  ;;  %v462_v52 = vpop.trf.xlu1 }
 0x19b   : > { %511 = vst.msk [vmem:[%s1378_s12 + $0x60] sm:$0xff] %vm498_vm0, %v462_v52 }
 0x1a1   : > { %v496_v53 = vpop.trf.xlu2 }
 0x1a2   : > { %529 = vst.msk [vmem:[%s1378_s12 + $0xf0] sm:$0xff] %vm498_vm0, %v496_v53  ;;  %v463_v54 = vpop.trf.xlu1 }
 0x1a3   : > { %512 = vst.msk [vmem:[%s1378_s12 + $0x68] sm:$0xff] %vm498_vm0, %v463_v54 }
 0x1a9   : > { %v497_v21 = vpop.trf.xlu2 }
 0x1aa   : > { %530 = vst.msk [vmem:[%s1378_s12 + $0xf8] sm:$0xff] %vm498_vm0, %v497_v21  ;;  %v464_v2 = vpop.trf.xlu1 }
 0x1ab   : > { %513 = vst.msk [vmem:[%s1378_s12 + $0x70] sm:$0xff] %vm498_vm0, %v464_v2 }
 0x1af   : > { %537 = sbr.rel (!%p1187_p4) target bundleno = 500 (0x1f4), region = 36 }
 0x1b2   : > { %v465_v55 = vpop.trf.xlu1 }
 0x1b3   : > { %514 = vst.msk [vmem:[%s1378_s12 + $0x78] sm:$0xff] %vm498_vm0, %v465_v55 }
 0x1b4   : > { %s1602_s16 = smov (!%p540_p8, %s539_s16), 32 }
 0x1b5   : > { %s876_s23 = sshll.u32 %s1602_s16, 3 }
 0x1b6   : > { %p879_p9 = scmp.eq.s32.totalorder %s876_s23, 0 }
 0x1b7   : > { %s1457_s21 = sshrl.u32 (!%p879_p9), %s1602_s16, 5 }
 0x1b8   : > { %548 = sbr.rel (%p879_p9) target bundleno = 500 (0x1f4), region = 40  ;;  %p880_p10 = scmp.le.s32.totalorder (!%p879_p9), %s1457_s21, 0 }
 0x1bd   : > { %824 = sbr.rel (%p880_p10) target bundleno = 483 (0x1e3), region = 116  ;;  %s1591_s0 = smov (!%p880_p10), %s1451_s22 }
 0x1be   : > { %s1592_s24 = smov (!%p880_p10), %s1378_s12  ;;  %s1466_s25 = smov (!%p880_p10), 0  }
 0x1bf   : > { %s1468_s26 = smov (!%p880_p10), 0  }
 0x1c2 LB: >> { %v673_v56 = vld [vmem:[%s1112_s24] sm:$0xff]  ;;  %v675_v57 = vld [vmem:[%s1112_s24 + $0x8] sm:$0xff]  ;;  %v677_v27 = vld [vmem:[%s1112_s24 + $0x10] sm:$0xff]  ;;  %s737_s27 = sadd.s32 1, %s1116_s25  ;;  %s667_s26 = sadd.s32 1, %s1120_s26   ;;  %s1120_s26 = sphi %s1468_s26, %s667_s26   ;;  %s1116_s25 = sphi %s1466_s25, %s1595_s25   ;;  %s1112_s24 = sphi %s1592_s24, %s1594_s24   ;;  %s1108_s0 = sphi %s1591_s0, %s1593_s0  }
 0x1c3   : >> { %674 = vst [vmem:[%s1108_s0] sm:$0xff] %v673_v56  ;;  %v679_v58 = vld [vmem:[%s1112_s24 + $0x18] sm:$0xff]  ;;  %p738_p11 = scmp.ge.s32.totalorder %s737_s27, %s1457_s21  ;;  %v681_v59 = vld [vmem:[%s1112_s24 + $0x20] sm:$0xff]  ;;  %v683_v60 = vld [vmem:[%s1112_s24 + $0x28] sm:$0xff]  ;;  %p666_p12 = scmp.ge.s32.totalorder %s667_s26, %s1457_s21 }
 0x1c4   : >> { %676 = vst [vmem:[%s1108_s0 + $0x8] sm:$0xff] %v675_v57  ;;  %v685_v28 = vld [vmem:[%s1112_s24 + $0x30] sm:$0xff]  ;;  %v687_v29 = vld [vmem:[%s1112_s24 + $0x38] sm:$0xff]  ;;  %v689_v61 = vld [vmem:[%s1112_s24 + $0x40] sm:$0xff] }
 0x1c5   : >> { %678 = vst [vmem:[%s1108_s0 + $0x10] sm:$0xff] %v677_v27  ;;  %s1604_s27 = smov (%p738_p11, %s737_s27), 0  ;;  %v691_v62 = vld [vmem:[%s1112_s24 + $0x48] sm:$0xff]  ;;  %v693_v17 = vld [vmem:[%s1112_s24 + $0x50] sm:$0xff]  ;;  %v695_v43 = vld [vmem:[%s1112_s24 + $0x58] sm:$0xff] }
 0x1c6   : >> { %680 = vst [vmem:[%s1108_s0 + $0x18] sm:$0xff] %v679_v58  ;;  %s881_s28 = sshll.u32 %s1604_s27, 8  ;;  %v697_v63 = vld [vmem:[%s1112_s24 + $0x60] sm:$0xff]  ;;  %v699_v0 = vld [vmem:[%s1112_s24 + $0x68] sm:$0xff]  ;;  %v701_v40 = vld [vmem:[%s1112_s24 + $0x70] sm:$0xff]  ;;  %s1595_s25 = smov %s1604_s27 }
 0x1c7   : >> { %682 = vst [vmem:[%s1108_s0 + $0x20] sm:$0xff] %v681_v59  ;;  %s1500_s29 = scalar_lea.vmem %s1378_s12, %s881_s28 [#allocation3]   ;;  %s1503_s30 = scalar_lea.vmem %s1451_s22, %s881_s28   ;;  %v703_v41 = vld [vmem:[%s1112_s24 + $0x78] sm:$0xff]  ;;  %v705_v8 = vld [vmem:[%s1112_s24 + $0x80] sm:$0xff]  ;;  %v707_v10 = vld [vmem:[%s1112_s24 + $0x88] sm:$0xff] }
 0x1c8   : >> { %684 = vst [vmem:[%s1108_s0 + $0x28] sm:$0xff] %v683_v60  ;;  %v709_v47 = vld [vmem:[%s1112_s24 + $0x90] sm:$0xff]  ;;  %v711_v48 = vld [vmem:[%s1112_s24 + $0x98] sm:$0xff]  ;;  %v713_v11 = vld [vmem:[%s1112_s24 + $0xa0] sm:$0xff] }
 0x1c9   : >> { %686 = vst [vmem:[%s1108_s0 + $0x30] sm:$0xff] %v685_v28  ;;  %v715_v12 = vld [vmem:[%s1112_s24 + $0xa8] sm:$0xff]  ;;  %v717_v7 = vld [vmem:[%s1112_s24 + $0xb0] sm:$0xff]  ;;  %v719_v9 = vld [vmem:[%s1112_s24 + $0xb8] sm:$0xff] }
 0x1ca   : >> { %688 = vst [vmem:[%s1108_s0 + $0x38] sm:$0xff] %v687_v29  ;;  %v721_v18 = vld [vmem:[%s1112_s24 + $0xc0] sm:$0xff]  ;;  %v723_v13 = vld [vmem:[%s1112_s24 + $0xc8] sm:$0xff]  ;;  %v725_v1 = vld [vmem:[%s1112_s24 + $0xd0] sm:$0xff] }
 0x1cb   : >> { %690 = vst [vmem:[%s1108_s0 + $0x40] sm:$0xff] %v689_v61  ;;  %v727_v6 = vld [vmem:[%s1112_s24 + $0xd8] sm:$0xff]  ;;  %v729_v14 = vld [vmem:[%s1112_s24 + $0xe0] sm:$0xff]  ;;  %v731_v15 = vld [vmem:[%s1112_s24 + $0xe8] sm:$0xff] }
 0x1cc   : >> { %692 = vst [vmem:[%s1108_s0 + $0x48] sm:$0xff] %v691_v62  ;;  %v733_v4 = vld [vmem:[%s1112_s24 + $0xf0] sm:$0xff]  ;;  %v735_v16 = vld [vmem:[%s1112_s24 + $0xf8] sm:$0xff]  ;;  %s1594_s24 = smov %s1500_s29 }
 0x1cd   : >> { %694 = vst [vmem:[%s1108_s0 + $0x50] sm:$0xff] %v693_v17 }
 0x1ce   : >> { %696 = vst [vmem:[%s1108_s0 + $0x58] sm:$0xff] %v695_v43 }
 0x1cf   : >> { %698 = vst [vmem:[%s1108_s0 + $0x60] sm:$0xff] %v697_v63 }
 0x1d0   : >> { %700 = vst [vmem:[%s1108_s0 + $0x68] sm:$0xff] %v699_v0 }
 0x1d1   : >> { %702 = vst [vmem:[%s1108_s0 + $0x70] sm:$0xff] %v701_v40 }
 0x1d2   : >> { %704 = vst [vmem:[%s1108_s0 + $0x78] sm:$0xff] %v703_v41 }
 0x1d3   : >> { %706 = vst [vmem:[%s1108_s0 + $0x80] sm:$0xff] %v705_v8 }
 0x1d4   : >> { %708 = vst [vmem:[%s1108_s0 + $0x88] sm:$0xff] %v707_v10 }
 0x1d5   : >> { %710 = vst [vmem:[%s1108_s0 + $0x90] sm:$0xff] %v709_v47 }
 0x1d6   : >> { %712 = vst [vmem:[%s1108_s0 + $0x98] sm:$0xff] %v711_v48 }
 0x1d7   : >> { %714 = vst [vmem:[%s1108_s0 + $0xa0] sm:$0xff] %v713_v11 }
 0x1d8   : >> { %716 = vst [vmem:[%s1108_s0 + $0xa8] sm:$0xff] %v715_v12 }
 0x1d9   : >> { %718 = vst [vmem:[%s1108_s0 + $0xb0] sm:$0xff] %v717_v7 }
 0x1da   : >> { %720 = vst [vmem:[%s1108_s0 + $0xb8] sm:$0xff] %v719_v9 }
 0x1db   : >> { %722 = vst [vmem:[%s1108_s0 + $0xc0] sm:$0xff] %v721_v18 }
 0x1dc   : >> { %724 = vst [vmem:[%s1108_s0 + $0xc8] sm:$0xff] %v723_v13 }
 0x1dd   : >> { %726 = vst [vmem:[%s1108_s0 + $0xd0] sm:$0xff] %v725_v1 }
 0x1de   : >> { %728 = vst [vmem:[%s1108_s0 + $0xd8] sm:$0xff] %v727_v6  ;;  %669 = sbr.rel (!%p666_p12) target bundleno = 450 (0x1c2), region = 122 }
 0x1df   : >> { %730 = vst [vmem:[%s1108_s0 + $0xe0] sm:$0xff] %v729_v14 }
 0x1e0   : >> { %732 = vst [vmem:[%s1108_s0 + $0xe8] sm:$0xff] %v731_v15 }
 0x1e1   : >> { %734 = vst [vmem:[%s1108_s0 + $0xf0] sm:$0xff] %v733_v4 }
 0x1e2   : >> { %736 = vst [vmem:[%s1108_s0 + $0xf8] sm:$0xff] %v735_v16  ;;  %s1593_s0 = smov %s1503_s30 }
 0x1e3 PF: > { %s1568_s4 = sand.u32 31, %s1602_s16   ;;  %s892_s5 = sshll.u32 %s1457_s21, 8 }
 0x1e4   : > { %s748_s6 = scalar_lea.vmem %s1378_s12, %s892_s5 [#allocation3]   ;;  %s750_s7 = scalar_lea.vmem %s1451_s22, %s892_s5  }
 0x1e5   : > { %p886_p13 = scmp.le.s32.totalorder %s1568_s4, 0 }
 0x1e6   : > { %s1122_s8 = smov (!%p886_p13), %s750_s7   ;;  %s1126_s9 = smov (!%p886_p13), %s748_s6  }
 0x1e7   : > { %838 = sbr.rel (%p886_p13) target bundleno = 500 (0x1f4), region = 127  ;;  %s1130_s10 = smov (!%p886_p13), 0  }
 0x1e8   : > { %s1134_s11 = smov (!%p886_p13), 0  }
 0x1ec LB: >> { %v760_v5 = vld [vmem:[%s1128_s9] sm:$0xff]  ;;  %s762_s14 = sadd.s32 1, %s1132_s10  ;;  %s754_s11 = sadd.s32 1, %s1136_s11   ;;  %s1136_s11 = sphi %s1134_s11, %s754_s11   ;;  %s1132_s10 = sphi %s1130_s10, %s1131_s10   ;;  %s1128_s9 = sphi %s1126_s9, %s767_s9   ;;  %s1124_s8 = sphi %s1122_s8, %s768_s8  }
 0x1ed   : >> { %761 = vst [vmem:[%s1124_s8] sm:$0xff] %v760_v5  ;;  %p763_p0 = scmp.ge.s32.totalorder %s762_s14, %s1568_s4  ;;  %p753_p1 = scmp.ge.s32.totalorder %s754_s11, %s1568_s4 }
 0x1ef   : >> { %s1606_s14 = smov (%p763_p0, %s762_s14), 0  ;;  %756 = sbr.rel (!%p753_p1) target bundleno = 492 (0x1ec), region = 133 }
 0x1f0   : >> { %s887_s12 = sshll.u32 %s1606_s14, 3  ;;  %s1131_s10 = smov %s1606_s14  }
 0x1f1   : >> { %s767_s9 = scalar_lea.vmem %s748_s6, %s887_s12 [#allocation3]   ;;  %s768_s8 = scalar_lea.vmem %s750_s7, %s887_s12  }
 0x1f4 PF: > { %p11_p2 = scmp.ge.s32.totalorder %s1177_s17, 4   ;;  %s1596_s14 = smov %s1100_s15 }
 0x1f5   : > { %s1597_s15 = smov %s1185_s20  ;;  %s1598_s16 = smov %s1177_s17 }
 0x1f6   :  { %13 = sbr.rel (!%p11_p2) target bundleno = 4 (0x4), region = 144 }

</bundles_post_ra>
